<compile_context>
chip_gen: v7x
topology: tpu7x:2x2x1
jax: 0.10.0
libtpu: 0.0.40
codegen_flags: <defaults>
</compile_context>

<pallas_src>
import functools

import jax
import jax.numpy as jnp
from jax.experimental import pallas as pl
from jax.experimental.pallas import tpu as pltpu

# Acrobot-v1: 6-dim observation, 3 discrete actions.
STRUCTURE = ((6, 64), (64, 64))          # shared trunk
ACTOR_HEAD = ((64, 32), (32, 3))         # ends with log_softmax
CRITIC_HEAD = ((64, 32), (32, 1))        # scalar value

OBS_DIM = STRUCTURE[0][0]                # 6
PAD_OBS = 16                             # obs dim zero-padded to a bf16 sublane tile
HID = STRUCTURE[0][1]                    # 64
WIDE = 2 * HID                           # 128 = folded lane width (two batch halves)
HEAD_HID = ACTOR_HEAD[0][1]              # 32
N_ACT = ACTOR_HEAD[-1][1]                # 3
OUT_COLS = N_ACT + 1                     # 3 log-probs + 1 value

# Packed-weight row offsets (all 16-row / bf16-sublane-tile aligned).
R0A = 0                                  # layer-0 weights -> lanes 0:64   (first batch half)
R0B = PAD_OBS                            # layer-0 weights -> lanes 64:128 (second batch half)
R1 = 2 * PAD_OBS                         # trunk layer 1 (128x128 block-diagonal)
R2 = R1 + WIDE                           # fused actor|critic head layer 0 (block-diagonal)
R3T = R2 + WIDE                          # transposed fused final layer (16 x 128)
W_ROWS = R3T + PAD_OBS                   # 304

_MASK_NEG = -1e30                        # finite big-negative for masked softmax rows


# -----------------------------------------------------------------------------
# Kernel
# -----------------------------------------------------------------------------
def _fused_kernel(xa_ref, xb_ref, w_ref, b_ref, bo_ref, o_ref):
    """xa/xb: (half, OBS_DIM) f32 — the two halves of this tile's batch rows.
    w_ref: (W_ROWS, WIDE) bf16 packed weights; b_ref: (3, WIDE) f32 layer biases;
    bo_ref: (OUT_COLS, 1) f32 final-layer bias; o_ref: (OUT_COLS, 2*half) f32."""
    half = xa_ref.shape[0]
    biases = b_ref[...]                                       # (3, WIDE) f32

    def pad_cast(x):                                          # in-kernel cast + lane pad 6 -> 16
        zeros = jnp.zeros((half, PAD_OBS - OBS_DIM), jnp.float32)
        return jnp.concatenate([x, zeros], axis=1).astype(jnp.bfloat16)

    xa = pad_cast(xa_ref[...])
    xb = pad_cast(xb_ref[...])

    # Layer 0, batch-folded: each zero-blocked weight slab routes its batch half
    # into its own 64-lane block; the MXU f32 accumulation does the "concat".
    h = (jnp.dot(xa, w_ref[R0A:R0A + PAD_OBS, :], preferred_element_type=jnp.float32)
         + jnp.dot(xb, w_ref[R0B:R0B + PAD_OBS, :], preferred_element_type=jnp.float32))
    h = jnp.maximum(h + biases[0:1, :], 0.0)                  # (half, 128) f32

    def dense_relu(h_f32, row_lo, b_row):
        y = jnp.dot(h_f32.astype(jnp.bfloat16), w_ref[row_lo:row_lo + WIDE, :],
                    preferred_element_type=jnp.float32)
        return jnp.maximum(y + biases[b_row:b_row + 1, :], 0.0)

    h = dense_relu(h, R1, 1)                                  # trunk layer 1
    h = dense_relu(h, R2, 2)                                  # fused actor|critic head layer 0

    # Final fused layer computed TRANSPOSED (contract the lane dim of both
    # operands, flash-attention q@k^T pattern) so the softmax epilogue and the
    # store are lane-dense.  Rows 0:4 = first-half outputs, rows 8:12 = second.
    zt = jax.lax.dot_general(
        w_ref[R3T:R3T + PAD_OBS, :], h.astype(jnp.bfloat16),
        (((1,), (1,)), ((), ())), preferred_element_type=jnp.float32)   # (16, half)
    b_out = bo_ref[...]                                       # (OUT_COLS, 1), lane-broadcast

    def head_log_softmax(z4):       # (OUT_COLS, half): rows 0..2 = logits, row 3 = value
        row = jax.lax.broadcasted_iota(jnp.int32, z4.shape, 0)
        is_logit = row < N_ACT
        m = jnp.max(jnp.where(is_logit, z4, _MASK_NEG), axis=0, keepdims=True)
        shifted = z4 - m
        e = jnp.exp(jnp.where(is_logit, shifted, _MASK_NEG))  # exp(-1e30) == 0
        lse = jnp.log(jnp.sum(e, axis=0, keepdims=True))
        return jnp.where(is_logit, shifted - lse, z4)

    oa = head_log_softmax(zt[0:OUT_COLS, :] + b_out)          # first batch half
    ob = head_log_softmax(zt[8:8 + OUT_COLS, :] + b_out)      # second batch half
    o_ref[...] = jnp.concatenate([oa, ob], axis=1)            # lane-dense (4, tb) store


# -----------------------------------------------------------------------------
# Host-side parameter handling
# -----------------------------------------------------------------------------
def init_params(key):
    """Deterministic PyTorch-style (kaiming-uniform) init; weights are (in, out)."""
    params = []
    for group in (STRUCTURE, ACTOR_HEAD, CRITIC_HEAD):
        group_params = []
        for (fan_in, fan_out) in group:
            key, kw, kb = jax.random.split(key, 3)
            bound = 1.0 / jnp.sqrt(jnp.float32(fan_in))
            w = jax.random.uniform(kw, (fan_in, fan_out), jnp.float32, -bound, bound)
            b = jax.random.uniform(kb, (1, fan_out), jnp.float32, -bound, bound)
            group_params.append((w, b))
        params.append(group_params)
    return params  # [trunk, actor_head, critic_head]


def pack_params(params):
    """Pack all layers into one resident bf16 weight buffer (128-lane folded
    block-diagonal layout) plus two small f32 bias buffers."""
    trunk, actor_head, critic_head = params
    (w0, b0), (w1, b1) = trunk
    (aw0, ab0), (aw1, ab1) = actor_head
    (cw0, cb0), (cw1, cb1) = critic_head

    def block_diag2(w):                                       # (64,64) -> (128,128)
        z = jnp.zeros((WIDE, WIDE), jnp.float32)
        return z.at[:HID, :HID].set(w).at[HID:, HID:].set(w)

    # Layer 0: two zero-blocked slabs, one per batch half / lane half.
    w0p = jnp.zeros((PAD_OBS, HID), jnp.float32).at[:OBS_DIM, :].set(w0)
    seg0 = jnp.zeros((2 * PAD_OBS, WIDE), jnp.float32)
    seg0 = seg0.at[:PAD_OBS, :HID].set(w0p)
    seg0 = seg0.at[PAD_OBS:, HID:].set(w0p)

    seg1 = block_diag2(w1)                                    # trunk layer 1
    seg2 = block_diag2(jnp.concatenate([aw0, cw0], axis=1))   # fused heads layer 0

    # Fused final layer (actor 32->3 | critic 32->1), stored transposed per half.
    w3f = jnp.zeros((HID, OUT_COLS), jnp.float32)
    w3f = w3f.at[:HEAD_HID, :N_ACT].set(aw1)
    w3f = w3f.at[HEAD_HID:, N_ACT:].set(cw1)
    seg3 = jnp.zeros((PAD_OBS, WIDE), jnp.float32)
    seg3 = seg3.at[:OUT_COLS, :HID].set(w3f.T)
    seg3 = seg3.at[8:8 + OUT_COLS, HID:].set(w3f.T)

    w_packed = jnp.concatenate([seg0, seg1, seg2, seg3], axis=0).astype(jnp.bfloat16)

    rows = [b0, b1, jnp.concatenate([ab0, cb0], axis=1)]      # each (1, 64)
    b_packed = jnp.concatenate(
        [jnp.concatenate([r, r], axis=1) for r in rows], axis=0)          # (3, 128) f32
    b_out = jnp.concatenate([ab1[0], cb1[0]]).reshape(OUT_COLS, 1)        # (4, 1) f32
    return w_packed, b_packed, b_out


# -----------------------------------------------------------------------------
# Batch / tile planning
# -----------------------------------------------------------------------------
def _round_up(v, m):
    return -(-v // m) * m


def _plan_batch(batch, batch_tile=None):
    """Pick (padded_batch, batch_tile). Tiles are multiples of 16 (so the 2-way
    batch fold keeps 8-row sublane alignment); multi-step grids use 128-multiple
    tiles so the (OUT_COLS, tb) output block stays lane-aligned."""
    if batch_tile is not None:
        tb = _round_up(batch_tile, 16)
    elif batch > 4096:
        # Big tiles amortize the ~0.35us/step overhead; >=2 steps keep both
        # v7x TensorCores busy via the "parallel" grid axis.
        steps = max(2, pl.cdiv(batch, 8192))
        tb = _round_up(pl.cdiv(batch, steps), 256)
    elif batch >= 1024:
        tb = _round_up(pl.cdiv(batch, 2), 128)    # two ~equal steps (v7x 2-TC)
    else:
        tb = _round_up(batch, 16)                 # single full-array step
    pb = _round_up(batch, tb)
    if pb != tb and tb % 128 != 0:                # multi-step -> 128-lane-aligned out tile
        tb = _round_up(tb, 128)
        pb = _round_up(batch, tb)
    return pb, tb


# -----------------------------------------------------------------------------
# Forward pass
# -----------------------------------------------------------------------------
@functools.partial(jax.jit, static_argnames=("batch_tile",))
def actor_critic_forward(x, w_packed, b_packed, b_out, batch_tile=None):
    """x: (B, OBS_DIM) float32. Returns (log_probs (B, N_ACT), value (B, 1))."""
    batch = x.shape[0]
    pb, tb = _plan_batch(batch, batch_tile)
    half = tb // 2
    grid = (pb // tb,)

    if pb != batch:                                # only for oddly-sized batches
        x = jnp.pad(x, ((0, pb - batch), (0, 0)))

    cost = pl.CostEstimate(
        flops=2 * pb * (PAD_OBS * WIDE + 2 * WIDE * HID + PAD_OBS * HID),
        transcendentals=pb * (N_ACT + 1),
        bytes_accessed=(pb * OBS_DIM * 4 + w_packed.size * 2 + b_packed.size * 4
                        + b_out.size * 4 + pb * OUT_COLS * 4),
    )

    out = pl.pallas_call(
        _fused_kernel,
        out_shape=jax.ShapeDtypeStruct((OUT_COLS, pb), jnp.float32),
        grid=grid,
        in_specs=[
            pl.BlockSpec((half, OBS_DIM), lambda i: (2 * i, 0)),      # rows [i*tb, i*tb+half)
            pl.BlockSpec((half, OBS_DIM), lambda i: (2 * i + 1, 0)),  # rows [i*tb+half, (i+1)*tb)
            pl.BlockSpec((W_ROWS, WIDE), lambda i: (0, 0)),           # packed weights: resident
            pl.BlockSpec((3, WIDE), lambda i: (0, 0)),                # layer biases: resident
            pl.BlockSpec((OUT_COLS, 1), lambda i: (0, 0)),            # final-layer bias: resident
        ],
        out_specs=pl.BlockSpec((OUT_COLS, tb), lambda i: (0, i)),     # lane-dense transposed out
        compiler_params=pltpu.CompilerParams(
            dimension_semantics=("parallel",),
            vmem_limit_bytes=32 * 1024 * 1024,
        ),
        cost_estimate=cost,
    )(x, x, w_packed, b_packed, b_out)

    return out[:N_ACT, :batch].T, out[N_ACT:, :batch].T


# -----------------------------------------------------------------------------
# References
# -----------------------------------------------------------------------------
def reference_forward(x, params, match_kernel_dtypes=True):
    """Pure-JAX reference. If match_kernel_dtypes, mirrors the kernel's bf16
    matmul inputs / f32 accumulation so it agrees to ~float32 roundoff."""
    trunk, actor_head, critic_head = params
    cast = (lambda v: v.astype(jnp.bfloat16)) if match_kernel_dtypes else (lambda v: v)

    def dense(h, w, b, relu):
        y = jnp.dot(cast(h), cast(w), preferred_element_type=jnp.float32) + b
        return jax.nn.relu(y) if relu else y

    h = x
    for w, b in trunk:
        h = dense(h, w, b, True)
    a = h
    for i, (w, b) in enumerate(actor_head):
        a = dense(a, w, b, i < len(actor_head) - 1)
    a = jax.nn.log_softmax(a, axis=-1)
    c = h
    for i, (w, b) in enumerate(critic_head):
        c = dense(c, w, b, i < len(critic_head) - 1)
    return a, c


# -----------------------------------------------------------------------------
# Demo / self-test
# -----------------------------------------------------------------------------
if __name__ == "__main__":
    key = jax.random.PRNGKey(0)
    key, kx, kx2 = jax.random.split(key, 3)

    params = init_params(key)
    w_packed, b_packed, b_out = pack_params(params)

    # Small multi-step grid: batch 256 in two 128-row tiles (exercises the
    # pipelined "parallel" batch grid / v7x 2-TC sharding path).
    batch = 256
    x = jax.random.normal(kx, (batch, OBS_DIM), jnp.float32)
    actor, critic = actor_critic_forward(x, w_packed, b_packed, b_out, batch_tile=128)
    actor, critic = jax.block_until_ready((actor, critic))
    assert actor.shape == (batch, N_ACT)
    assert critic.shape == (batch, 1)

    # Tight check against a reference that mirrors the kernel's bf16 matmuls.
    ref_a, ref_c = reference_forward(x, params, match_kernel_dtypes=True)
    assert jnp.allclose(actor, ref_a, atol=2e-4, rtol=2e-4)
    assert jnp.allclose(critic, ref_c, atol=2e-4, rtol=2e-4)

    # Odd batch exercises the wrapper-side row padding + single-step grid.
    x2 = jax.random.normal(kx2, (10, OBS_DIM), jnp.float32)
    a2, c2 = actor_critic_forward(x2, w_packed, b_packed, b_out)
    a2, c2 = jax.block_until_ready((a2, c2))
    r2a, r2c = reference_forward(x2, params, match_kernel_dtypes=True)
    assert a2.shape == (10, N_ACT) and c2.shape == (10, 1)
    assert jnp.allclose(a2, r2a, atol=2e-4, rtol=2e-4)
    assert jnp.allclose(c2, r2c, atol=2e-4, rtol=2e-4)

    # Loose sanity check against the pure-f32 PyTorch-equivalent forward
    # (difference is only the bf16 matmul-input rounding).
    f32_a, f32_c = reference_forward(x, params, match_kernel_dtypes=False)
    assert jnp.allclose(actor, f32_a, atol=5e-2, rtol=5e-2)
    assert jnp.allclose(critic, f32_c, atol=5e-2, rtol=5e-2)

    print("KERNEL_OK")
</pallas_src>

<mosaic_0001>
module attributes {stable_mosaic.version = 11 : i64} {
  func.func @_fused_kernel(%arg0: i32, %arg1: memref<64x6xf32, #tpu.memory_space<vmem>>, %arg2: memref<64x6xf32, #tpu.memory_space<vmem>>, %arg3: memref<304x128xbf16, #tpu.memory_space<vmem>>, %arg4: memref<3x128xf32, #tpu.memory_space<vmem>>, %arg5: memref<4x1xf32, #tpu.memory_space<vmem>>, %arg6: memref<4x128xf32, #tpu.memory_space<vmem>>) attributes {dimension_semantics = [#tpu.dimension_semantics<parallel>], iteration_bounds = array<i64: 2>, scalar_prefetch = 0 : i64, scratch_operands = 0 : i64, tpu.core_type = #tpu.core_type<tc>, window_params = [{transform_indices = @transform_0, window_bounds = array<i64: 64, 6>}, {transform_indices = @transform_1, window_bounds = array<i64: 64, 6>}, {pipeline_mode = #tpu.pipeline_mode<synchronous>, transform_indices = @transform_2, window_bounds = array<i64: 304, 128>}, {pipeline_mode = #tpu.pipeline_mode<synchronous>, transform_indices = @transform_3, window_bounds = array<i64: 3, 128>}, {pipeline_mode = #tpu.pipeline_mode<synchronous>, transform_indices = @transform_4, window_bounds = array<i64: 4, 1>}, {transform_indices = @transform_5, window_bounds = array<i64: 4, 128>}]} {
    %c0 = arith.constant 0 : index
    %c0_0 = arith.constant 0 : index
    %0 = vector.load %arg4[%c0, %c0_0] : memref<3x128xf32, #tpu.memory_space<vmem>>, vector<3x128xf32>
    %c0_1 = arith.constant 0 : index
    %c0_2 = arith.constant 0 : index
    %1 = vector.load %arg1[%c0_1, %c0_2] : memref<64x6xf32, #tpu.memory_space<vmem>>, vector<64x6xf32>
    %cst = arith.constant 0.000000e+00 : f32
    %2 = vector.broadcast %cst : f32 to vector<64x10xf32>
    %3 = tpu.concatenate %1, %2 in 1 : vector<64x6xf32>, vector<64x10xf32> -> vector<64x16xf32>
    %4 = arith.truncf %3 : vector<64x16xf32> to vector<64x16xbf16>
    %c0_3 = arith.constant 0 : index
    %c0_4 = arith.constant 0 : index
    %5 = vector.load %arg2[%c0_3, %c0_4] : memref<64x6xf32, #tpu.memory_space<vmem>>, vector<64x6xf32>
    %cst_5 = arith.constant 0.000000e+00 : f32
    %6 = vector.broadcast %cst_5 : f32 to vector<64x10xf32>
    %7 = tpu.concatenate %5, %6 in 1 : vector<64x6xf32>, vector<64x10xf32> -> vector<64x16xf32>
    %8 = arith.truncf %7 : vector<64x16xf32> to vector<64x16xbf16>
    %c0_6 = arith.constant 0 : index
    %c0_7 = arith.constant 0 : index
    %9 = vector.load %arg3[%c0_6, %c0_7] : memref<304x128xbf16, #tpu.memory_space<vmem>>, vector<16x128xbf16>
    %cst_8 = arith.constant dense<0.000000e+00> : vector<64x128xf32>
    %10 = tpu.matmul %4, %9, %cst_8 {dimension_numbers = #tpu.dot_dimension_numbers<[1], [0], [0], [1], [0, 0, 1, 1], [], []>} : vector<64x16xbf16>, vector<16x128xbf16>, vector<64x128xf32> -> vector<64x128xf32>
    %c16 = arith.constant 16 : index
    %c0_9 = arith.constant 0 : index
    %11 = vector.load %arg3[%c16, %c0_9] : memref<304x128xbf16, #tpu.memory_space<vmem>>, vector<16x128xbf16>
    %cst_10 = arith.constant dense<0.000000e+00> : vector<64x128xf32>
    %12 = tpu.matmul %8, %11, %cst_10 {dimension_numbers = #tpu.dot_dimension_numbers<[1], [0], [0], [1], [0, 0, 1, 1], [], []>} : vector<64x16xbf16>, vector<16x128xbf16>, vector<64x128xf32> -> vector<64x128xf32>
    %13 = arith.addf %10, %12 : vector<64x128xf32>
    %14 = vector.extract_strided_slice %0 {offsets = [0, 0], sizes = [1, 128], strides = [1, 1]} : vector<3x128xf32> to vector<1x128xf32>
    %15 = vector.broadcast %14 : vector<1x128xf32> to vector<64x128xf32>
    %16 = arith.addf %13, %15 : vector<64x128xf32>
    %cst_11 = arith.constant 0.000000e+00 : f32
    %17 = vector.broadcast %cst_11 : f32 to vector<64x128xf32>
    %18 = arith.maximumf %16, %17 : vector<64x128xf32>
    %19 = arith.truncf %18 : vector<64x128xf32> to vector<64x128xbf16>
    %c32 = arith.constant 32 : index
    %c0_12 = arith.constant 0 : index
    %20 = vector.load %arg3[%c32, %c0_12] : memref<304x128xbf16, #tpu.memory_space<vmem>>, vector<128x128xbf16>
    %cst_13 = arith.constant dense<0.000000e+00> : vector<64x128xf32>
    %21 = tpu.matmul %19, %20, %cst_13 {dimension_numbers = #tpu.dot_dimension_numbers<[1], [0], [0], [1], [0, 0, 1, 1], [], []>} : vector<64x128xbf16>, vector<128x128xbf16>, vector<64x128xf32> -> vector<64x128xf32>
    %22 = vector.extract_strided_slice %0 {offsets = [1, 0], sizes = [1, 128], strides = [1, 1]} : vector<3x128xf32> to vector<1x128xf32>
    %23 = vector.broadcast %22 : vector<1x128xf32> to vector<64x128xf32>
    %24 = arith.addf %21, %23 : vector<64x128xf32>
    %cst_14 = arith.constant 0.000000e+00 : f32
    %25 = vector.broadcast %cst_14 : f32 to vector<64x128xf32>
    %26 = arith.maximumf %24, %25 : vector<64x128xf32>
    %27 = arith.truncf %26 : vector<64x128xf32> to vector<64x128xbf16>
    %c160 = arith.constant 160 : index
    %c0_15 = arith.constant 0 : index
    %28 = vector.load %arg3[%c160, %c0_15] : memref<304x128xbf16, #tpu.memory_space<vmem>>, vector<128x128xbf16>
    %cst_16 = arith.constant dense<0.000000e+00> : vector<64x128xf32>
    %29 = tpu.matmul %27, %28, %cst_16 {dimension_numbers = #tpu.dot_dimension_numbers<[1], [0], [0], [1], [0, 0, 1, 1], [], []>} : vector<64x128xbf16>, vector<128x128xbf16>, vector<64x128xf32> -> vector<64x128xf32>
    %30 = vector.extract_strided_slice %0 {offsets = [2, 0], sizes = [1, 128], strides = [1, 1]} : vector<3x128xf32> to vector<1x128xf32>
    %31 = vector.broadcast %30 : vector<1x128xf32> to vector<64x128xf32>
    %32 = arith.addf %29, %31 : vector<64x128xf32>
    %cst_17 = arith.constant 0.000000e+00 : f32
    %33 = vector.broadcast %cst_17 : f32 to vector<64x128xf32>
    %34 = arith.maximumf %32, %33 : vector<64x128xf32>
    %c288 = arith.constant 288 : index
    %c0_18 = arith.constant 0 : index
    %35 = vector.load %arg3[%c288, %c0_18] : memref<304x128xbf16, #tpu.memory_space<vmem>>, vector<16x128xbf16>
    %36 = arith.truncf %34 : vector<64x128xf32> to vector<64x128xbf16>
    %cst_19 = arith.constant dense<0.000000e+00> : vector<16x64xf32>
    %37 = tpu.matmul %35, %36, %cst_19 {dimension_numbers = #tpu.dot_dimension_numbers<[1], [1], [0], [0], [0, 0, 1, 0], [], []>} : vector<16x128xbf16>, vector<64x128xbf16>, vector<16x64xf32> -> vector<16x64xf32>
    %c0_20 = arith.constant 0 : index
    %c0_21 = arith.constant 0 : index
    %38 = vector.load %arg5[%c0_20, %c0_21] : memref<4x1xf32, #tpu.memory_space<vmem>>, vector<4x1xf32>
    %39 = vector.extract_strided_slice %37 {offsets = [0, 0], sizes = [4, 64], strides = [1, 1]} : vector<16x64xf32> to vector<4x64xf32>
    %40 = vector.broadcast %38 : vector<4x1xf32> to vector<4x64xf32>
    %41 = arith.addf %39, %40 : vector<4x64xf32>
    %42 = tpu.iota {dimensions = array<i32: 0>} : vector<4x64xi32>
    %c3_i32 = arith.constant 3 : i32
    %43 = vector.broadcast %c3_i32 : i32 to vector<4x64xi32>
    %44 = arith.cmpi slt, %42, %43 : vector<4x64xi32>
    %cst_22 = arith.constant -1.000000e+30 : f32
    %45 = vector.broadcast %cst_22 : f32 to vector<4x64xf32>
    %46 = arith.select %44, %41, %45 : vector<4x64xi1>, vector<4x64xf32>
    %cst_23 = arith.constant dense<0xFF800000> : vector<64xf32>
    %47 = vector.multi_reduction <maximumf>, %46, %cst_23 [0] : vector<4x64xf32> to vector<64xf32>
    %48 = vector.shape_cast %47 : vector<64xf32> to vector<1x64xf32>
    %49 = vector.broadcast %48 : vector<1x64xf32> to vector<4x64xf32>
    %50 = arith.subf %41, %49 : vector<4x64xf32>
    %cst_24 = arith.constant -1.000000e+30 : f32
    %51 = vector.broadcast %cst_24 : f32 to vector<4x64xf32>
    %52 = arith.select %44, %50, %51 : vector<4x64xi1>, vector<4x64xf32>
    %53 = math.exp %52 : vector<4x64xf32>
    %cst_25 = arith.constant dense<0.000000e+00> : vector<64xf32>
    %54 = vector.multi_reduction <add>, %53, %cst_25 [0] : vector<4x64xf32> to vector<64xf32>
    %55 = vector.shape_cast %54 : vector<64xf32> to vector<1x64xf32>
    %56 = math.log %55 : vector<1x64xf32>
    %57 = vector.broadcast %56 : vector<1x64xf32> to vector<4x64xf32>
    %58 = arith.subf %50, %57 : vector<4x64xf32>
    %59 = arith.select %44, %58, %41 : vector<4x64xi1>, vector<4x64xf32>
    %60 = vector.extract_strided_slice %37 {offsets = [8, 0], sizes = [4, 64], strides = [1, 1]} : vector<16x64xf32> to vector<4x64xf32>
    %61 = vector.broadcast %38 : vector<4x1xf32> to vector<4x64xf32>
    %62 = arith.addf %60, %61 : vector<4x64xf32>
    %63 = tpu.iota {dimensions = array<i32: 0>} : vector<4x64xi32>
    %c3_i32_26 = arith.constant 3 : i32
    %64 = vector.broadcast %c3_i32_26 : i32 to vector<4x64xi32>
    %65 = arith.cmpi slt, %63, %64 : vector<4x64xi32>
    %cst_27 = arith.constant -1.000000e+30 : f32
    %66 = vector.broadcast %cst_27 : f32 to vector<4x64xf32>
    %67 = arith.select %65, %62, %66 : vector<4x64xi1>, vector<4x64xf32>
    %cst_28 = arith.constant dense<0xFF800000> : vector<64xf32>
    %68 = vector.multi_reduction <maximumf>, %67, %cst_28 [0] : vector<4x64xf32> to vector<64xf32>
    %69 = vector.shape_cast %68 : vector<64xf32> to vector<1x64xf32>
    %70 = vector.broadcast %69 : vector<1x64xf32> to vector<4x64xf32>
    %71 = arith.subf %62, %70 : vector<4x64xf32>
    %cst_29 = arith.constant -1.000000e+30 : f32
    %72 = vector.broadcast %cst_29 : f32 to vector<4x64xf32>
    %73 = arith.select %65, %71, %72 : vector<4x64xi1>, vector<4x64xf32>
    %74 = math.exp %73 : vector<4x64xf32>
    %cst_30 = arith.constant dense<0.000000e+00> : vector<64xf32>
    %75 = vector.multi_reduction <add>, %74, %cst_30 [0] : vector<4x64xf32> to vector<64xf32>
    %76 = vector.shape_cast %75 : vector<64xf32> to vector<1x64xf32>
    %77 = math.log %76 : vector<1x64xf32>
    %78 = vector.broadcast %77 : vector<1x64xf32> to vector<4x64xf32>
    %79 = arith.subf %71, %78 : vector<4x64xf32>
    %80 = arith.select %65, %79, %62 : vector<4x64xi1>, vector<4x64xf32>
    %81 = tpu.concatenate %59, %80 in 1 : vector<4x64xf32>, vector<4x64xf32> -> vector<4x128xf32>
    %c0_31 = arith.constant 0 : index
    %c0_32 = arith.constant 0 : index
    %82 = vector.load %arg6[%c0_31, %c0_32] : memref<4x128xf32, #tpu.memory_space<vmem>>, vector<4x128xf32>
    tpu.vector_store %arg6[%c0_31, %c0_32], %81 {strides = array<i32>} : memref<4x128xf32, #tpu.memory_space<vmem>>, vector<4x128xf32>,
    return
  }
  func.func @transform_0(%arg0: i32) -> (i32, i32) {
    %c2_i32 = arith.constant 2 : i32
    %0 = arith.muli %c2_i32, %arg0 : i32
    %c0_i32 = arith.constant 0 : i32
    %c0_i32_0 = arith.constant 0 : i32
    return %0, %c0_i32 : i32, i32
  }
  func.func @transform_1(%arg0: i32) -> (i32, i32) {
    %c2_i32 = arith.constant 2 : i32
    %0 = arith.muli %c2_i32, %arg0 : i32
    %c1_i32 = arith.constant 1 : i32
    %1 = arith.addi %0, %c1_i32 : i32
    %c0_i32 = arith.constant 0 : i32
    %c0_i32_0 = arith.constant 0 : i32
    return %1, %c0_i32 : i32, i32
  }
  func.func @transform_2(%arg0: i32) -> (i32, i32) {
    %c0_i32 = arith.constant 0 : i32
    %c0_i32_0 = arith.constant 0 : i32
    %c0_i32_1 = arith.constant 0 : i32
    return %c0_i32, %c0_i32_0 : i32, i32
  }
  func.func @transform_3(%arg0: i32) -> (i32, i32) {
    %c0_i32 = arith.constant 0 : i32
    %c0_i32_0 = arith.constant 0 : i32
    %c0_i32_1 = arith.constant 0 : i32
    return %c0_i32, %c0_i32_0 : i32, i32
  }
  func.func @transform_4(%arg0: i32) -> (i32, i32) {
    %c0_i32 = arith.constant 0 : i32
    %c0_i32_0 = arith.constant 0 : i32
    %c0_i32_1 = arith.constant 0 : i32
    return %c0_i32, %c0_i32_0 : i32, i32
  }
  func.func @transform_5(%arg0: i32) -> (i32, i32) {
    %c0_i32 = arith.constant 0 : i32
    %c0_i32_0 = arith.constant 0 : i32
    return %c0_i32, %arg0 : i32, i32
  }
}

</mosaic_0001>

<bundles_post_ra>
// kernel: actor_critic_forward.1
= control target key start
LH: loop header
LB: loop body
LE: loop exit
PB: predicated region body
PF: predicated region fallthrough
CT: control target
= control target key end

     0   :  { %s1237_s18 = smov 0   ;;  %s1386_s0 = inlined_call_operand.vmem [shape: f32[256,6], index: 0, kind: input, shape index: {}, may-alias: {0,1}]   ;;  %s1387_s1 = inlined_call_operand.vmem [shape: f32[256,6], index: 1, kind: input, shape index: {}, may-alias: {0,1}]   ;;  %s1388_s2 = inlined_call_operand.vmem [shape: bf16[304,128], index: 2, kind: input, shape index: {}]   ;;  %s1389_s3 = inlined_call_operand.vmem [shape: f32[3,128], index: 3, kind: input, shape index: {}]   ;;  %s1390_s4 = inlined_call_operand.vmem [shape: f32[4,1], index: 4, kind: input, shape index: {}]   ;;  %s1391_s5 = inlined_call_operand.vmem [shape: f32[4,256], index: 5, kind: output, shape index: {}]  }
   0x1 LB: > { %s1243_s19 = sadd.s32 4294967295, %s1201_s18   ;;  %p983_p0 = scmp.ge.s32.totalorder %s1201_s18, 1  ;;  %s1201_s18 = sphi %s1237_s18, %s15_s18  }
   0x2   : > { %p211_p1 = scmp.lt.s32.totalorder %s1201_s18, 3 }
   0x4   : > { %p212_p2 = pnand %p983_p0, %p211_p1 }
   0x5   : > { %v1168_v0 = vld [vmem:[%s1388_s2 + $0x8] sm:$0xff] (!%p212_p2)   ;;  %s1024_s22 = sshll.u32 (!%p212_p2), %s1243_s19, 4  ;;  %v1169_v1 = vld [vmem:[%s1388_s2] sm:$0xff] (!%p212_p2)   ;;  %v1170_v2 = vld [vmem:[%s1388_s2 + $0x10] sm:$0xff] (!%p212_p2)   ;;  %vm278_vm0 = vcmask (!%p212_p2), 48128   ;;  %vm321_vm1 = vcmask (!%p212_p2), 130048   ;;  %v482_v56 = vlaneseq (!%p212_p2) }
   0x6   : > { %215 = sbr.rel (%p212_p2) target bundleno = 1125 (0x465), region = 40  ;;  %p248_p3 = scmp.lt.s32.totalorder (!%p212_p2), %s1024_s22, 31  ;;  %1067 = vmatprep.subr.bf16.mxu0 (!%p212_p2), %v1168_v0  ;;  %v1171_v3 = vld [vmem:[%s1388_s2 + $0x18] sm:$0xff] (!%p212_p2)   ;;  %1087 = vmatprep.subr.bf16.mxu1 (!%p212_p2), %v1170_v2  ;;  %v1172_v4 = vld [vmem:[%s1388_s2 + $0x20] sm:$0xff] (!%p212_p2)   ;;  %v1173_v24 = vld [vmem:[%s1388_s2 + $0x28] sm:$0xff] (!%p212_p2)   ;;  %vm1204_vm2 = vmmov (!%p212_p2), 0  }
   0x7   : > { %s1026_s23 = sadd.s32 (!%p212_p2), 8, %s1024_s22  ;;  %1068 = vmatpush3.bf16.msra.mxu0 (!%p212_p2), %v1168_v0  ;;  %1088 = vmatpush3.bf16.msra.mxu1 (!%p212_p2), %v1170_v2  ;;  %v1174_v29 = vld [vmem:[%s1388_s2 + $0x30] sm:$0xff] (!%p212_p2)   ;;  %v1175_v36 = vld [vmem:[%s1388_s2 + $0x38] sm:$0xff] (!%p212_p2)   ;;  %v1176_v48 = vld [vmem:[%s1388_s2 + $0x40] sm:$0xff] (!%p212_p2)   ;;  %v1336_v57 = vshrl.u32 (!%p212_p2), %v482_v56, 7  ;;  %vm856_vm4 = vcmask (!%p212_p2), 519168  }
   0x8   : > { %p257_p4 = scmp.lt.s32.totalorder (!%p212_p2), %s1026_s23, 31  ;;  %1077 = vmatprep.subr.bf16.mxu0 (!%p212_p2), %v1169_v1  ;;  %1089 = vmatprep.subr.bf16.mxu1 (!%p212_p2), %v1171_v3  ;;  %v1177_v49 = vld [vmem:[%s1388_s2 + $0x48] sm:$0xff] (!%p212_p2)   ;;  %v1178_v50 = vld [vmem:[%s1388_s2 + $0x50] sm:$0xff] (!%p212_p2)   ;;  %v1179_v51 = vld [vmem:[%s1388_s2 + $0x58] sm:$0xff] (!%p212_p2)   ;;  %s1206_s26 = smov (!%p212_p2), 64   ;;  %vm907_vm5 = vcmask (!%p212_p2), 523264  }
   0x9   : > { %v1180_v52 = vld [vmem:[%s1388_s2 + $0x60] sm:$0xff] (!%p212_p2)   ;;  %v1181_v53 = vld [vmem:[%s1388_s2 + $0x68] sm:$0xff] (!%p212_p2)   ;;  %v1182_v54 = vld [vmem:[%s1388_s2 + $0x70] sm:$0xff] (!%p212_p2)   ;;  %v484_v58 = vsub.s32 (!%p212_p2), 0, %v1336_v57  ;;  %vm854_vm3 = vcmp.lt.s32.totalorder (!%p212_p2), %v1336_v57, 3  ;;  %p264_p5 = scmp.lt.s32.totalorder (!%p212_p2), %s1243_s19, 1 }
   0xa   : > { %v1183_v55 = vld [vmem:[%s1388_s2 + $0x78] sm:$0xff] (!%p212_p2)   ;;  %v1342_v59 = vld [vmem:[%s1389_s3] sm:$0x7] (!%p212_p2) }
   0xb   : > { %1090 = vmatpush3.bf16.msra.mxu1 (!%p212_p2), %v1171_v3  ;;  %v485_v60 = vrot.slane (!%p212_p2), %v1342_v59, %v484_v58  ;;  %v1203_v58 = vmov (!%p212_p2), 0.0  }
   0xc   : > { %1091 = vmatprep.subr.bf16.mxu1 (!%p212_p2), %v1172_v4 }
   0xd   : > { %s1393_s22 = smov (!%p248_p3, %s1024_s22), 31  ;;  %s1395_s23 = smov (!%p257_p4, %s1026_s23), 31 }
   0xe   : > { %s986_s30 = sshll.u32 %s1393_s22, 3  ;;  %s989_s6 = sshll.u32 %s1395_s23, 3 }
   0xf   : > { %s260_s9 = scalar_lea.vmem %s1387_s1, %s989_s6  ;;  %s1266_s12 = scalar_lea.vmem %s1386_s0, %s986_s30  ;;  %1092 = vmatpush3.bf16.msra.mxu1 %v1172_v4 }
  0x10   : > { %v291_v5 = vld [vmem:[%s260_s9] sm:$0xff]  ;;  %v292_v6 = vld [vmem:[%s260_s9 + $0x8] sm:$0xff]  ;;  %v293_v7 = vld [vmem:[%s260_s9 + $0x10] sm:$0xff]  ;;  %1093 = vmatprep.subr.bf16.mxu1 %v1173_v24  ;;  %s1397_s19 = smov (!%p264_p5, %s1243_s19), 1 }
  0x11   : > { %v299_v8 = vsel %vm278_vm0, %v291_v5, 0.0  ;;  %v300_v9 = vsel %vm278_vm0, %v292_v6, 0.0  ;;  %v294_v10 = vld [vmem:[%s260_s9 + $0x18] sm:$0xff]  ;;  %v301_v11 = vsel %vm278_vm0, %v293_v7, 0.0  ;;  %v295_v12 = vld [vmem:[%s260_s9 + $0x20] sm:$0xff]  ;;  %v296_v13 = vld [vmem:[%s260_s9 + $0x28] sm:$0xff] }
  0x12   : > { %v307_v14 = vpack.c.bf16 %v300_v9, %v299_v8  ;;  %v302_v15 = vsel %vm278_vm0, %v294_v10, 0.0  ;;  %v303_v16 = vsel %vm278_vm0, %v295_v12, 0.0  ;;  %v304_v17 = vsel %vm278_vm0, %v296_v13, 0.0  ;;  %v297_v18 = vld [vmem:[%s260_s9 + $0x30] sm:$0xff]  ;;  %v270_v19 = vld [vmem:[%s1266_s12] sm:$0xff]  ;;  %v271_v20 = vld [vmem:[%s1266_s12 + $0x8] sm:$0xff] }
  0x13   : > { %v308_v21 = vpack.c.bf16 %v302_v15, %v301_v11  ;;  %v309_v22 = vpack.c.bf16 %v304_v17, %v303_v16  ;;  %v298_v23 = vld [vmem:[%s260_s9 + $0x38] sm:$0xff]  ;;  %v305_v25 = vsel %vm278_vm0, %v297_v18, 0.0  ;;  %v279_v26 = vsel %vm278_vm0, %v270_v19, 0.0  ;;  %v272_v31 = vld [vmem:[%s1266_s12 + $0x10] sm:$0xff]  ;;  %v274_v34 = vld [vmem:[%s1266_s12 + $0x20] sm:$0xff]  ;;  %1094 = vmatpush3.bf16.msra.mxu1 %v1173_v24  ;;  %s990_s27 = sshll.u32 %s1397_s19, 2 }
  0x14   : > { %1069 = vmatprep.mubr.msk.bf16.mxu0 %vm321_vm1, %v307_v14  ;;  %v280_v27 = vsel %vm278_vm0, %v271_v20, 0.0  ;;  %v306_v28 = vsel %vm278_vm0, %v298_v23, 0.0  ;;  %v273_v32 = vld [vmem:[%s1266_s12 + $0x18] sm:$0xff]  ;;  %v275_v35 = vld [vmem:[%s1266_s12 + $0x28] sm:$0xff]  ;;  %1095 = vmatprep.subr.bf16.mxu1 %v1174_v29  ;;  %v281_v37 = vsel %vm278_vm0, %v272_v31, 0.0  ;;  %v283_v39 = vsel %vm278_vm0, %v274_v34, 0.0  ;;  %s267_s30 = scalar_lea.vmem %s1391_s5, %s990_s27 }
  0x15   : > { %1070 = vmatmul.mubr.msk.bf16.vlgmr.msra.gmra.mrb[0].mxu0 %vm321_vm1, %v308_v21  ;;  %v310_v30 = vpack.c.bf16 %v306_v28, %v305_v25  ;;  %v287_v33 = vpack.c.bf16 %v280_v27, %v279_v26  ;;  %v282_v38 = vsel %vm278_vm0, %v273_v32, 0.0  ;;  %v284_v40 = vsel %vm278_vm0, %v275_v35, 0.0  ;;  %v276_v43 = vld [vmem:[%s1266_s12 + $0x30] sm:$0xff]  ;;  %v277_v44 = vld [vmem:[%s1266_s12 + $0x38] sm:$0xff]  ;;  %v1184_v25 = vld [vmem:[%s1388_s2 + $0x80] sm:$0xff]  }
  0x16   : > { %1078 = vmatpush3.bf16.msra.mxu0 %v1169_v1  ;;  %1073 = vmatprep.mubr.msk.bf16.mxu0 %vm321_vm1, %v309_v22  ;;  %v288_v41 = vpack.c.bf16 %v282_v38, %v281_v37  ;;  %v289_v42 = vpack.c.bf16 %v284_v40, %v283_v39  ;;  %v285_v45 = vsel %vm278_vm0, %v276_v43, 0.0  ;;  %v286_v46 = vsel %vm278_vm0, %v277_v44, 0.0  ;;  %v1185_v26 = vld [vmem:[%s1388_s2 + $0x88] sm:$0xff]  }
  0x17   : > { %1096 = vmatpush3.bf16.msra.mxu1 %v1174_v29  ;;  %v290_v47 = vpack.c.bf16 %v286_v46, %v285_v45  ;;  %1111 = vmatprep.subr.bf16.mxu0 %v1178_v50  ;;  %v524_v27 = vsub.s32 1, %v1336_v57 }
  0x18   : > { %1097 = vmatprep.subr.bf16.mxu1 %v1175_v36 }
  0x19   : > { %v525_v28 = vrot.slane %v1342_v59, %v524_v27  ;;  %v1186_v27 = vld [vmem:[%s1388_s2 + $0x90] sm:$0xff]  }
  0x1b   : > { %1098 = vmatpush3.bf16.msra.mxu1 %v1175_v36 }
  0x1c   : > { %1099 = vmatprep.subr.bf16.mxu1 %v1176_v48 }
  0x1d   : > { %1074 = vmatmul.mubr.msk.bf16.gmra.mrb[4].mxu0 %vm321_vm1, %v310_v30 }
  0x1e   : > { %1079 = vmatprep.mubr.msk.bf16.mxu0 %vm321_vm1, %v287_v33 }
  0x1f   : > { %1100 = vmatpush3.bf16.msra.mxu1 %v1176_v48 }
  0x20   : > { %1101 = vmatprep.subr.bf16.mxu1 %v1177_v49 }
  0x23   : > { %1102 = vmatpush3.bf16.msra.mxu1 %v1177_v49 }
  0x24   : > { %1135 = vmatprep.subr.bf16.mxu1 %v1203_v58 }
  0x25   : > { %1080 = vmatmul.mubr.msk.bf16.vlgmr.msra.gmra.mrb[0].mxu0 %vm321_vm1, %v288_v41 }
  0x26   : > { %1083 = vmatprep.mubr.msk.bf16.mxu0 %vm321_vm1, %v289_v42  ;;  %1112 = vmatpush3.bf16.msra.mxu0 %v1178_v50 }
  0x27   : > { %1113 = vmatprep.subr.bf16.mxu0 %v1179_v51 }
  0x2a   : > { %1114 = vmatpush3.bf16.msra.mxu0 %v1179_v51 }
  0x2b   : > { %1115 = vmatprep.subr.bf16.mxu0 %v1180_v52 }
  0x2d   : > { %1084 = vmatmul.mubr.msk.bf16.gmra.mrb[4].mxu0 %vm321_vm1, %v290_v47 }
  0x2e   : > { %1116 = vmatpush3.bf16.msra.mxu0 %v1180_v52 }
  0x2f   : > { %1117 = vmatprep.subr.bf16.mxu0 %v1181_v53 }
  0x32   : > { %1118 = vmatpush3.bf16.msra.mxu0 %v1181_v53 }
  0x33   : > { %1119 = vmatprep.subr.bf16.mxu0 %v1182_v54 }
  0x36   : > { %1120 = vmatpush3.bf16.msra.mxu0 %v1182_v54 }
  0x37   : > { %1121 = vmatprep.subr.bf16.mxu0 %v1183_v55 }
  0x3a   : > { %1122 = vmatpush3.bf16.msra.mxu0 %v1183_v55 }
  0x3b   : > { %1123 = vmatprep.subr.bf16.mxu0 %v1184_v25 }
  0x3e   : > { %1124 = vmatpush3.bf16.msra.mxu0 %v1184_v25 }
  0x3f   : > { %1125 = vmatprep.subr.bf16.mxu0 %v1185_v26 }
  0x42   : > { %1126 = vmatpush3.bf16.msra.mxu0 %v1185_v26 }
  0xf8   : > { %v1081_v61 = vpop.f32.mrb[0].mxu0 }
  0xf9   : > { %v488_v62 = vadd.f32 %v1081_v61, %v485_v60  ;;  %v451_v63 = vpop.f32.mrb[1].mxu0  ;;  %v1205_v61 = vmov 0  }
  0xfa   : > { %v486_v0 = vadd.f32 %v485_v60, %v451_v63  ;;  %v1082_v1 = vpop.f32.mrb[2].mxu0  ;;  %1167 = vset.pattern.permute.xlu0 %v1205_v61 }
  0xfb   : > { %v489_v2 = vadd.f32 %v1082_v1, %v485_v60  ;;  %v454_v3 = vpop.f32.mrb[3].mxu0  ;;  %v496_v5 = vmax.f32 %v488_v62, 0.0  ;;  %v669_v62 = vsub.s32 2, %v1336_v57 }
  0xfc   : > { %v487_v4 = vadd.f32 %v485_v60, %v454_v3  ;;  %v494_v7 = vmax.f32 %v486_v0, 0.0 }
  0xfd   : > { %v497_v6 = vmax.f32 %v489_v2, 0.0  ;;  %v670_v63 = vrot.slane %v1342_v59, %v669_v62 }
  0xfe   : > { %v495_v8 = vmax.f32 %v487_v4, 0.0 }
  0xff   : > { %v503_v9 = vpack.c.bf16 %v497_v6, %v496_v5 }
 0x100   : > { %v1085_v10 = vpop.f32.mrb[4].mxu0  ;;  %v502_v11 = vpack.c.bf16 %v495_v8, %v494_v7 }
 0x101   : > { %v492_v12 = vadd.f32 %v1085_v10, %v485_v60  ;;  %v467_v13 = vpop.f32.mrb[5].mxu0 }
 0x102   : > { %v490_v14 = vadd.f32 %v485_v60, %v467_v13  ;;  %v1086_v15 = vpop.f32.mrb[6].mxu0  ;;  %1103 = vmatprep.mubr.bf16.mxu1 %v502_v11 }
 0x103   : > { %v493_v16 = vadd.f32 %v1086_v15, %v485_v60  ;;  %v470_v17 = vpop.f32.mrb[7].mxu0  ;;  %1104 = vmatmul.mubr.bf16.vlgmr.msra.gmra.mrb[0].mxu1 %v503_v9  ;;  %v500_v19 = vmax.f32 %v492_v12, 0.0 }
 0x104   : > { %v491_v18 = vadd.f32 %v485_v60, %v470_v17  ;;  %v498_v21 = vmax.f32 %v490_v14, 0.0  ;;  %v845_v60 = vld [vmem:[%s1390_s4] sm:$0xf] }
 0x105   : > { %v501_v20 = vmax.f32 %v493_v16, 0.0  ;;  %848 = vperm.xlu0 %1167, %v845_v60  }
 0x106   : > { %v499_v22 = vmax.f32 %v491_v18, 0.0 }
 0x107   : > { %v505_v23 = vpack.c.bf16 %v501_v20, %v500_v19 }
 0x108   : > { %v504_v24 = vpack.c.bf16 %v499_v22, %v498_v21 }
 0x10a   : > { %1107 = vmatprep.mubr.bf16.mxu1 %v504_v24 }
 0x10b   : > { %1108 = vmatmul.mubr.bf16.gmra.mrb[4].mxu1 %v505_v23 }
 0x10c   : > { %1143 = vmatprep.mubr.msk.bf16.mxu1 %vm1204_vm2, %v1203_v58 }
 0x1d6   : > { %v1105_v29 = vpop.f32.mrb[0].mxu1 }
 0x1d7   : > { %v617_v30 = vadd.f32 %v1105_v29, %v525_v28  ;;  %v608_v31 = vpop.f32.mrb[1].mxu1 }
 0x1d8   : > { %v609_v32 = vadd.f32 %v608_v31, %v525_v28  ;;  %v1106_v33 = vpop.f32.mrb[2].mxu1 }
 0x1d9   : > { %v620_v34 = vadd.f32 %v1106_v33, %v525_v28  ;;  %v611_v35 = vpop.f32.mrb[3].mxu1  ;;  %v641_v37 = vmax.f32 %v617_v30, 0.0 }
 0x1da   : > { %v612_v36 = vadd.f32 %v611_v35, %v525_v28  ;;  %v639_v39 = vmax.f32 %v609_v32, 0.0 }
 0x1db   : > { %v642_v38 = vmax.f32 %v620_v34, 0.0 }
 0x1dc   : > { %v640_v40 = vmax.f32 %v612_v36, 0.0 }
 0x1dd   : > { %v648_v41 = vpack.c.bf16 %v642_v38, %v641_v37 }
 0x1de   : > { %v647_v42 = vpack.c.bf16 %v640_v40, %v639_v39  ;;  %v1109_v43 = vpop.f32.mrb[4].mxu1 }
 0x1df   : > { %v633_v44 = vadd.f32 %v1109_v43, %v525_v28  ;;  %v624_v45 = vpop.f32.mrb[5].mxu1 }
 0x1e0   : > { %v625_v46 = vadd.f32 %v624_v45, %v525_v28  ;;  %v1110_v47 = vpop.f32.mrb[6].mxu1  ;;  %1127 = vmatprep.mubr.bf16.mxu0 %v647_v42 }
 0x1e1   : > { %v636_v48 = vadd.f32 %v1110_v47, %v525_v28  ;;  %v627_v49 = vpop.f32.mrb[7].mxu1  ;;  %1128 = vmatmul.mubr.bf16.vlgmr.msra.gmra.mrb[8].mxu0 %v648_v41  ;;  %v645_v51 = vmax.f32 %v633_v44, 0.0 }
 0x1e2   : > { %v628_v50 = vadd.f32 %v627_v49, %v525_v28  ;;  %v643_v53 = vmax.f32 %v625_v46, 0.0  ;;  %v849_v28 = vpop.permute.xlu0 %848 }
 0x1e3   : > { %v646_v52 = vmax.f32 %v636_v48, 0.0 }
 0x1e4   : > { %v644_v54 = vmax.f32 %v628_v50, 0.0 }
 0x1e5   : > { %v650_v55 = vpack.c.bf16 %v646_v52, %v645_v51 }
 0x1e6   : > { %v649_v56 = vpack.c.bf16 %v644_v54, %v643_v53 }
 0x1e8   : > { %1131 = vmatprep.mubr.bf16.mxu0 %v649_v56 }
 0x1e9   : > { %1132 = vmatmul.mubr.bf16.gmra.mrb[12].mxu0 %v650_v55 }
 0x2b4   : > { %v1129_v0 = vpop.f32.mrb[8].mxu0 }
 0x2b5   : > { %v762_v1 = vadd.f32 %v1129_v0, %v670_v63  ;;  %v753_v2 = vpop.f32.mrb[9].mxu0 }
 0x2b6   : > { %v754_v3 = vadd.f32 %v753_v2, %v670_v63  ;;  %v1130_v4 = vpop.f32.mrb[10].mxu0 }
 0x2b7   : > { %v765_v5 = vadd.f32 %v1130_v4, %v670_v63  ;;  %v756_v6 = vpop.f32.mrb[11].mxu0  ;;  %v786_v8 = vmax.f32 %v762_v1, 0.0 }
 0x2b8   : > { %v757_v7 = vadd.f32 %v756_v6, %v670_v63  ;;  %v784_v10 = vmax.f32 %v754_v3, 0.0 }
 0x2b9   : > { %v787_v9 = vmax.f32 %v765_v5, 0.0 }
 0x2ba   : > { %v785_v11 = vmax.f32 %v757_v7, 0.0 }
 0x2bb   : > { %v795_v12 = vpack.c.bf16 %v787_v9, %v786_v8 }
 0x2bc   : > { %v794_v13 = vpack.c.bf16 %v785_v11, %v784_v10  ;;  %v1133_v14 = vpop.f32.mrb[12].mxu0 }
 0x2bd   : > { %v778_v15 = vadd.f32 %v1133_v14, %v670_v63  ;;  %v769_v16 = vpop.f32.mrb[13].mxu0 }
 0x2be   : > { %v770_v17 = vadd.f32 %v769_v16, %v670_v63  ;;  %v1134_v18 = vpop.f32.mrb[14].mxu0  ;;  %1136 = vmatpush3.bf16.xpose.msra.mxu1 %v794_v13 }
 0x2bf   : > { %v781_v59 = vadd.f32 %v1134_v18, %v670_v63  ;;  %v772_v19 = vpop.f32.mrb[15].mxu0  ;;  %1137 = vmatprep.subr.bf16.mxu1 %v1203_v58  ;;  %v790_v21 = vmax.f32 %v778_v15, 0.0 }
 0x2c0   : > { %v773_v20 = vadd.f32 %v772_v19, %v670_v63  ;;  %v788_v23 = vmax.f32 %v770_v17, 0.0 }
 0x2c1   : > { %v791_v22 = vmax.f32 %v781_v59, 0.0 }
 0x2c2   : > { %v789_v24 = vmax.f32 %v773_v20, 0.0 }
 0x2c3   : > { %v797_v25 = vpack.c.bf16 %v791_v22, %v790_v21 }
 0x2c4   : > { %v796_v26 = vpack.c.bf16 %v789_v24, %v788_v23 }
 0x2c6   : > { %1138 = vmatpush3.bf16.xpose.msra.mxu1 %v795_v12 }
 0x2c7   : > { %1139 = vmatprep.subr.bf16.mxu1 %v1203_v58 }
 0x2ce   : > { %1140 = vmatpush3.bf16.xpose.msra.mxu1 %v796_v26 }
 0x2cf   : > { %1141 = vmatprep.subr.bf16.mxu1 %v1203_v58 }
 0x2d6   : > { %1142 = vmatpush3.bf16.xpose.msra.mxu1 %v797_v25 }
 0x2dd   : > { %1144 = vmatmul.mubr.bf16.vlgmr.msra.gmra.mrb[8].mxu1 %v1186_v27 }
 0x3b0   : > { %v838_v29 = vpop.f32.mrb[8].mxu1 }
 0x3b1   : > { %v851_v30 = vadd.f32 %v849_v28, %v838_v29  ;;  %v1145_v31 = vpop.f32.mrb[9].mxu1 }
 0x3b2   : > { %v841_v32 = vpop.f32.mrb[10].mxu1 }
 0x3b3   : > { %v855_v33 = vsel %vm854_vm3, %v851_v30, -1e+30  ;;  %v879_v34 = vadd.f32 %v849_v28, %v841_v32  ;;  %v1146_v35 = vpop.f32.mrb[11].mxu1 }
 0x3b4   : > { %v857_v36 = vsel %vm856_vm4, %v855_v33, -inf }
 0x3b5   : > { %v858_v37 = vrot.slane %v857_v36, 4  ;;  %v880_v38 = vsel %vm854_vm3, %v879_v34, -1e+30 }
 0x3b6   : > { %v881_v39 = vsel %vm856_vm4, %v880_v38, -inf }
 0x3b7   : > { %v859_v40 = vmax.f32 %v857_v36, %v858_v37  ;;  %v882_v41 = vrot.slane %v881_v39, 4 }
 0x3b9   : > { %v860_v42 = vrot.slane %v859_v40, 2  ;;  %v883_v43 = vmax.f32 %v881_v39, %v882_v41 }
 0x3bb   : > { %v861_v44 = vmax.f32 %v859_v40, %v860_v42  ;;  %v884_v45 = vrot.slane %v883_v43, 2 }
 0x3bd   : > { %v862_v46 = vrot.slane %v861_v44, 1  ;;  %v885_v47 = vmax.f32 %v883_v43, %v884_v45 }
 0x3bf   : > { %v863_v48 = vmax.f32 %v861_v44, %v862_v46  ;;  %v886_v49 = vrot.slane %v885_v47, 1 }
 0x3c1   : > { %v864_v50 = vsub.f32 %v851_v30, %v863_v48  ;;  %v887_v51 = vmax.f32 %v885_v47, %v886_v49 }
 0x3c3   : > { %v865_v52 = vsel %vm854_vm3, %v864_v50, -1e+30  ;;  %v888_v53 = vsub.f32 %v879_v34, %v887_v51 }
 0x3c4   : > { %v866_v54 = vmul.f32 1.442695, %v865_v52 }
 0x3c5   : > { %v889_v55 = vsel %vm854_vm3, %v888_v53, -1e+30 }
 0x3c6   : > { %1187 = vpow2.f32 %v866_v54  ;;  %v890_v56 = vmul.f32 1.442695, %v889_v55 }
 0x3c8   : > { %1189 = vpow2.f32 %v890_v56 }
 0x3d0   : > { %v1188_v58 = vpop.eup %1187 }
 0x3d1   : > { %v868_v60 = vsel %vm856_vm4, %v1188_v58, 0.0 }
 0x3d2   : > { %v1190_v61 = vpop.eup %1189  ;;  %v869_v62 = vrot.slane %v868_v60, 4 }
 0x3d3   : > { %v892_v63 = vsel %vm856_vm4, %v1190_v61, 0.0 }
 0x3d4   : > { %v870_v0 = vadd.f32 %v869_v62, %v868_v60  ;;  %v893_v1 = vrot.slane %v892_v63, 4 }
 0x3d6   : > { %v871_v2 = vrot.slane %v870_v0, 2  ;;  %v894_v3 = vadd.f32 %v893_v1, %v892_v63 }
 0x3d8   : > { %v872_v4 = vadd.f32 %v871_v2, %v870_v0  ;;  %v895_v5 = vrot.slane %v894_v3, 2 }
 0x3da   : > { %v873_v6 = vrot.slane %v872_v4, 1  ;;  %v896_v7 = vadd.f32 %v895_v5, %v894_v3 }
 0x3dc   : > { %v874_v8 = vadd.f32 %v873_v6, %v872_v4  ;;  %v897_v9 = vrot.slane %v896_v7, 1 }
 0x3de   : > { %1191 = vlog2.f32 %v874_v8  ;;  %v898_v10 = vadd.f32 %v897_v9, %v896_v7 }
 0x3e0   : > { %1193 = vlog2.f32 %v898_v10 }
 0x3e8   : > { %v1192_v11 = vpop.eup %1191 }
 0x3e9   : > { %v876_v12 = vmul.f32 0.6931472, %v1192_v11 }
 0x3ea   : > { %v1194_v13 = vpop.eup %1193 }
 0x3eb   : > { %v877_v14 = vsub.f32 %v864_v50, %v876_v12  ;;  %v900_v15 = vmul.f32 0.6931472, %v1194_v13 }
 0x3ed   : > { %v901_v16 = vsub.f32 %v888_v53, %v900_v15  ;;  %v878_v17 = vsel %vm854_vm3, %v877_v14, %v851_v30 }
 0x3ef   : > { %v902_v18 = vsel %vm854_vm3, %v901_v16, %v879_v34 }
 0x3f0   : > { %904 = vrot.lane.b32.xlu0 %v902_v18, %s1206_s26 }
 0x462   : > { %v905_v59 = vpop.permute.xlu0 %904 }
 0x463   : > { %v908_v19 = vsel %vm907_vm5, %v878_v17, %v905_v59 }
 0x464   : > { %909 = vst [vmem:[%s267_s30] sm:$0xf] %v908_v19 }
 0x465 PF: > { %s15_s18 = sadd.s32 1, %s1201_s18  }
 0x466   : > { %p12_p6 = scmp.ge.s32.totalorder %s15_s18, 4  }
 0x468   :  { %14 = sbr.rel (!%p12_p6) target bundleno = 1 (0x1), region = 73 }

</bundles_post_ra>
